<compile_context>
chip_gen: v5e
topology: v5e:2x2
jax: 0.10.0
libtpu: 0.0.40
codegen_flags: <defaults>
</compile_context>

<pallas_src>
import jax
import jax.numpy as jnp
from jax.experimental import pallas as pl
from jax.experimental.pallas import tpu as pltpu


def make_tcn_kernel(n_layers: int, seq_len: int, compute_dtype=jnp.float32):
    T = seq_len

    def dot(a, b):
        return jnp.dot(a.astype(compute_dtype), b.astype(compute_dtype),
                       preferred_element_type=jnp.float32)

    def tcn_kernel(x_ref, mask_ref,
                   w_in_ref, b_in_ref,
                   wd_ref, w1_ref, b_layer_ref,
                   w_out_ref, b_out_ref,
                   o_ref):
        x = x_ref[0]            # (C_in, BT)  bb batch elements folded on lanes
        m = mask_ref[0]         # (1,  BT)
        BT = x.shape[-1]

        # Position within each folded sequence; kept as a single sublane row
        # (1, BT) so the per-layer compares only touch one vreg row.
        t_idx = jax.lax.broadcasted_iota(jnp.int32, (1, BT), 1) % T

        # conv_in: 1x1 conv == channel matmul on the MXU
        h = dot(w_in_ref[...], x) + b_in_ref[...]             # (H, BT)

        for l in range(n_layers):           # static unroll over layers
            d = 2 ** l
            # h[t-d] and h[t+d] with Conv1d zero padding.  pltpu.roll requires
            # non-negative shifts, so the "t+d" (left) shift is a circular roll
            # by BT - d; the position mask zeroes columns that wrapped around or
            # crossed a batch seam.
            x_lo = jnp.where(t_idx >= d, pltpu.roll(h, shift=d, axis=1), 0.0)
            x_hi = jnp.where(t_idx < T - d,
                             pltpu.roll(h, shift=BT - d, axis=1), 0.0)

            # Fused dilated conv: one (H, 3H) @ (3H, BT) matmul instead of
            # three (H, H) @ (H, BT) dots plus two full-tile adds.
            stacked = jnp.concatenate([x_lo, h, x_hi], axis=0)   # (3H, BT)
            y = dot(wd_ref[l], stacked) + b_layer_ref[l, 0]
            y = jnp.maximum(y, 0.0)                               # ReLU
            y = dot(w1_ref[l], y) + b_layer_ref[l, 1]
            # TODO(synk): nn.Dropout is identity in eval mode; no stochastic path here.
            h = (h + y) * m                                       # residual + mask

        out = dot(w_out_ref[...], h) + b_out_ref[...]
        o_ref[0] = (out * m).astype(o_ref.dtype)

    return tcn_kernel


def single_stage_tcn(x, mask, params, n_layers, *,
                     num_batch_blocks: int = 1,
                     compute_dtype=jnp.float32):
    """x: (B, C_in, T) f32; mask: (B, 1, T) f32. Returns (B, C_out, T) f32.

    num_batch_blocks: 1 on v5e/v6e (single TensorCore, one big invocation);
                      2 on v7x so both TensorCores get a batch block.
    """
    w_in, b_in, wd, bd, w1, b1, w_out, b_out = params
    B, C_in, T = x.shape
    H = w_in.shape[0]
    C_out = w_out.shape[0]

    nb = num_batch_blocks
    assert B % nb == 0, "batch must divide evenly into batch blocks"
    bb = B // nb
    BT = bb * T

    # ---- wrapper-side weight repacking -------------------------------------
    # Fuse the 3 dilated-conv taps column-wise: (L, 3, H, H) -> (L, H, 3H) so
    # wd_fused[l] @ [x_lo; h; x_hi] == wd[l,0]@x_lo + wd[l,1]@h + wd[l,2]@x_hi.
    wd_fused = jnp.concatenate([wd[:, 0], wd[:, 1], wd[:, 2]], axis=-1)
    # Pack the two per-layer biases into one operand (fewer pallas_call inputs).
    b_layer = jnp.stack([bd, b1], axis=1)                       # (L, 2, H, 1)

    # Optional bf16 operands for v6e/v7x MXU (f32 accumulation kept in kernel).
    w_in_c = w_in.astype(compute_dtype)
    wd_c = wd_fused.astype(compute_dtype)
    w1_c = w1.astype(compute_dtype)
    w_out_c = w_out.astype(compute_dtype)

    # ---- fold batch into the lane axis -------------------------------------
    # (B, C, T) -> (nb, C, bb*T): wide, lane-dense RHS for every matmul.
    xf = x.reshape(nb, bb, C_in, T).transpose(0, 2, 1, 3).reshape(nb, C_in, BT)
    mf = mask.reshape(nb, bb, 1, T).transpose(0, 2, 1, 3).reshape(nb, 1, BT)

    def full_spec(shape):
        # whole array resident in VMEM, same block for every grid step
        ndim = len(shape)
        return pl.BlockSpec(shape, lambda g: (0,) * ndim)

    grid_spec = pltpu.PrefetchScalarGridSpec(
        num_scalar_prefetch=0,
        grid=(nb,),
        in_specs=[
            pl.BlockSpec((1, C_in, BT), lambda g: (g, 0, 0)),   # x (folded)
            pl.BlockSpec((1, 1, BT), lambda g: (g, 0, 0)),      # mask (folded)
            full_spec(w_in_c.shape),
            full_spec(b_in.shape),
            full_spec(wd_c.shape),
            full_spec(w1_c.shape),
            full_spec(b_layer.shape),
            full_spec(w_out_c.shape),
            full_spec(b_out.shape),
        ],
        out_specs=pl.BlockSpec((1, C_out, BT), lambda g: (g, 0, 0)),
    )

    # Advisory cost estimate so XLA can overlap this small custom call.
    flops = 2 * B * T * (H * C_in + n_layers * (3 * H * H + H * H) + C_out * H)
    bytes_accessed = 4 * (x.size + mask.size + w_in.size + b_in.size + wd.size
                          + bd.size + w1.size + b1.size + w_out.size + b_out.size
                          + B * C_out * T)
    ce = pl.CostEstimate(flops=flops, transcendentals=0,
                         bytes_accessed=bytes_accessed)

    out = pl.pallas_call(
        make_tcn_kernel(n_layers, T, compute_dtype),
        out_shape=jax.ShapeDtypeStruct((nb, C_out, BT), jnp.float32),
        grid_spec=grid_spec,
        compiler_params=pltpu.CompilerParams(
            dimension_semantics=("parallel",)),
        cost_estimate=ce,
    )(xf, mf, w_in_c, b_in, wd_c, w1_c, b_layer, w_out_c, b_out)

    # unfold lanes back to (B, C_out, T)
    return out.reshape(nb, C_out, bb, T).transpose(0, 2, 1, 3).reshape(B, C_out, T)


def ref_forward(x, mask, params, n_layers):
    """Pure-JAX reference matching PyTorch Conv1d semantics."""
    w_in, b_in, wd, bd, w1, b1, w_out, b_out = params
    h = jnp.einsum('hc,bct->bht', w_in, x) + b_in[None]
    T = h.shape[-1]
    for l in range(n_layers):
        d = 2 ** l
        hp = jnp.pad(h, ((0, 0), (0, 0), (d, d)))
        y = (jnp.einsum('oh,bht->bot', wd[l, 0], hp[..., 0:T])
             + jnp.einsum('oh,bht->bot', wd[l, 1], hp[..., d:d + T])
             + jnp.einsum('oh,bht->bot', wd[l, 2], hp[..., 2 * d:2 * d + T])
             + bd[l][None])
        y = jnp.maximum(y, 0.0)
        y = jnp.einsum('oh,bht->bot', w1[l], y) + b1[l][None]
        h = (h + y) * mask
    out = jnp.einsum('oh,bht->bot', w_out, h) + b_out[None]
    return out * mask


if __name__ == "__main__":
    # Module config (synthetic, deterministic init)
    in_channels, hidden_channels, out_channels, n_layers = 8, 32, 8, 3
    B, T = 2, 128

    key = jax.random.PRNGKey(0)
    ks = jax.random.split(key, 12)

    scale = 0.1
    # conv_in: Conv1d(in, hidden, 1) -> weight (H, C_in), bias (H, 1)
    w_in = scale * jax.random.normal(ks[0], (hidden_channels, in_channels), jnp.float32)
    b_in = scale * jax.random.normal(ks[1], (hidden_channels, 1), jnp.float32)
    # dilated layers: conv_dilated Conv1d(H, H, 3) -> (L, 3, H, H) [tap-major], bias (L, H, 1)
    wd = scale * jax.random.normal(ks[2], (n_layers, 3, hidden_channels, hidden_channels), jnp.float32)
    bd = scale * jax.random.normal(ks[3], (n_layers, hidden_channels, 1), jnp.float32)
    # per-layer 1x1 conv: (L, H, H), bias (L, H, 1)
    w1 = scale * jax.random.normal(ks[4], (n_layers, hidden_channels, hidden_channels), jnp.float32)
    b1 = scale * jax.random.normal(ks[5], (n_layers, hidden_channels, 1), jnp.float32)
    # conv_out: Conv1d(hidden, out, 1) -> (C_out, H), bias (C_out, 1)
    w_out = scale * jax.random.normal(ks[6], (out_channels, hidden_channels), jnp.float32)
    b_out = scale * jax.random.normal(ks[7], (out_channels, 1), jnp.float32)

    params = (w_in, b_in, wd, bd, w1, b1, w_out, b_out)

    # Inputs
    x = jax.random.normal(ks[8], (B, in_channels, T), jnp.float32)
    # binary mask (B, 1, T): valid prefix per sequence
    lengths = jnp.array([T, T // 2], dtype=jnp.int32)
    t_ids = jnp.arange(T, dtype=jnp.int32)[None, None, :]
    mask = (t_ids < lengths[:, None, None]).astype(jnp.float32)

    ref = ref_forward(x, mask, params, n_layers)

    # Default path: whole batch folded into lanes, single grid step (v5e/v6e).
    out = single_stage_tcn(x, mask, params, n_layers, num_batch_blocks=1)
    out = jax.block_until_ready(out)
    assert out.shape == (B, out_channels, T)
    assert jnp.allclose(out, ref, atol=1e-4, rtol=1e-3), \
        f"max abs diff (nb=1) = {jnp.max(jnp.abs(out - ref))}"

    # v7x-style path: 2-way parallel grid (one batch block per TensorCore).
    out2 = single_stage_tcn(x, mask, params, n_layers, num_batch_blocks=2)
    out2 = jax.block_until_ready(out2)
    assert jnp.allclose(out2, ref, atol=1e-4, rtol=1e-3), \
        f"max abs diff (nb=2) = {jnp.max(jnp.abs(out2 - ref))}"

    print("KERNEL_OK")
</pallas_src>

<mosaic_0001>
module attributes {stable_mosaic.version = 11 : i64} {
  func.func @tcn_kernel(%arg0: i32, %arg1: memref<1x8x256xf32, #tpu.memory_space<vmem>>, %arg2: memref<1x1x256xf32, #tpu.memory_space<vmem>>, %arg3: memref<32x8xf32, #tpu.memory_space<vmem>>, %arg4: memref<32x1xf32, #tpu.memory_space<vmem>>, %arg5: memref<3x32x96xf32, #tpu.memory_space<vmem>>, %arg6: memref<3x32x32xf32, #tpu.memory_space<vmem>>, %arg7: memref<3x2x32x1xf32, #tpu.memory_space<vmem>>, %arg8: memref<8x32xf32, #tpu.memory_space<vmem>>, %arg9: memref<8x1xf32, #tpu.memory_space<vmem>>, %arg10: memref<1x8x256xf32, #tpu.memory_space<vmem>>) attributes {dimension_semantics = [#tpu.dimension_semantics<parallel>], iteration_bounds = array<i64: 1>, scalar_prefetch = 0 : i64, scratch_operands = 0 : i64, tpu.core_type = #tpu.core_type<tc>, window_params = [{transform_indices = @transform_0, window_bounds = array<i64: 1, 8, 256>}, {transform_indices = @transform_1, window_bounds = array<i64: 1, 1, 256>}, {pipeline_mode = #tpu.pipeline_mode<synchronous>, transform_indices = @transform_2, window_bounds = array<i64: 32, 8>}, {pipeline_mode = #tpu.pipeline_mode<synchronous>, transform_indices = @transform_3, window_bounds = array<i64: 32, 1>}, {pipeline_mode = #tpu.pipeline_mode<synchronous>, transform_indices = @transform_4, window_bounds = array<i64: 3, 32, 96>}, {pipeline_mode = #tpu.pipeline_mode<synchronous>, transform_indices = @transform_5, window_bounds = array<i64: 3, 32, 32>}, {pipeline_mode = #tpu.pipeline_mode<synchronous>, transform_indices = @transform_6, window_bounds = array<i64: 3, 2, 32, 1>}, {pipeline_mode = #tpu.pipeline_mode<synchronous>, transform_indices = @transform_7, window_bounds = array<i64: 8, 32>}, {pipeline_mode = #tpu.pipeline_mode<synchronous>, transform_indices = @transform_8, window_bounds = array<i64: 8, 1>}, {transform_indices = @transform_9, window_bounds = array<i64: 1, 8, 256>}]} {
    %c0 = arith.constant 0 : index
    %c0_0 = arith.constant 0 : index
    %c0_1 = arith.constant 0 : index
    %0 = vector.load %arg1[%c0, %c0_0, %c0_1] : memref<1x8x256xf32, #tpu.memory_space<vmem>>, vector<1x8x256xf32>
    %1 = vector.shape_cast %0 : vector<1x8x256xf32> to vector<8x256xf32>
    %c0_2 = arith.constant 0 : index
    %c0_3 = arith.constant 0 : index
    %c0_4 = arith.constant 0 : index
    %2 = vector.load %arg2[%c0_2, %c0_3, %c0_4] : memref<1x1x256xf32, #tpu.memory_space<vmem>>, vector<1x1x256xf32>
    %3 = vector.shape_cast %2 : vector<1x1x256xf32> to vector<1x256xf32>
    %4 = tpu.iota {dimensions = array<i32: 1>} : vector<1x256xi32>
    %c128_i32 = arith.constant 128 : i32
    %c0_i32 = arith.constant 0 : i32
    %5 = arith.cmpi eq, %c128_i32, %c0_i32 : i32
    %c1_i32 = arith.constant 1 : i32
    %6 = arith.select %5, %c1_i32, %c128_i32 : i32
    %7 = vector.broadcast %6 : i32 to vector<1x256xi32>
    %8 = arith.remsi %4, %7 : vector<1x256xi32>
    %c0_i32_5 = arith.constant 0 : i32
    %9 = vector.broadcast %c0_i32_5 : i32 to vector<1x256xi32>
    %10 = arith.cmpi ne, %8, %9 : vector<1x256xi32>
    %c0_i32_6 = arith.constant 0 : i32
    %11 = vector.broadcast %c0_i32_6 : i32 to vector<1x256xi32>
    %12 = arith.cmpi slt, %8, %11 : vector<1x256xi32>
    %c0_i32_7 = arith.constant 0 : i32
    %13 = arith.cmpi slt, %6, %c0_i32_7 : i32
    %14 = vector.broadcast %13 : i1 to vector<1x256xi1>
    %15 = vector.broadcast %14 : vector<1x256xi1> to vector<1x256xi1>
    %16 = arith.xori %12, %15 : vector<1x256xi1>
    %17 = arith.andi %16, %10 : vector<1x256xi1>
    %18 = vector.broadcast %6 : i32 to vector<1x256xi32>
    %19 = arith.addi %8, %18 : vector<1x256xi32>
    %20 = arith.select %17, %19, %8 : vector<1x256xi1>, vector<1x256xi32>
    %c0_8 = arith.constant 0 : index
    %c0_9 = arith.constant 0 : index
    %21 = vector.load %arg3[%c0_8, %c0_9] : memref<32x8xf32, #tpu.memory_space<vmem>>, vector<32x8xf32>
    %cst = arith.constant dense<0.000000e+00> : vector<32x256xf32>
    %22 = tpu.matmul %21, %1, %cst {dimension_numbers = #tpu.dot_dimension_numbers<[1], [0], [0], [1], [0, 0, 1, 1], [], []>} : vector<32x8xf32>, vector<8x256xf32>, vector<32x256xf32> -> vector<32x256xf32>
    %c0_10 = arith.constant 0 : index
    %c0_11 = arith.constant 0 : index
    %23 = vector.load %arg4[%c0_10, %c0_11] : memref<32x1xf32, #tpu.memory_space<vmem>>, vector<32x1xf32>
    %24 = vector.broadcast %23 : vector<32x1xf32> to vector<32x256xf32>
    %25 = arith.addf %22, %24 : vector<32x256xf32>
    %c1_i32_12 = arith.constant 1 : i32
    %26 = vector.broadcast %c1_i32_12 : i32 to vector<1x256xi32>
    %27 = arith.cmpi sge, %20, %26 : vector<1x256xi32>
    %c1_i32_13 = arith.constant 1 : i32
    %28 = tpu.dynamic_rotate %25 by %c1_i32_13 dim 1 : vector<32x256xf32>, i32 -> vector<32x256xf32>
    %cst_14 = arith.constant 0.000000e+00 : f32
    %29 = vector.shape_cast %27 : vector<1x256xi1> to vector<1x256xi1>
    %30 = vector.broadcast %29 : vector<1x256xi1> to vector<32x256xi1>
    %31 = vector.broadcast %cst_14 : f32 to vector<32x256xf32>
    %32 = arith.select %30, %28, %31 : vector<32x256xi1>, vector<32x256xf32>
    %c127_i32 = arith.constant 127 : i32
    %33 = vector.broadcast %c127_i32 : i32 to vector<1x256xi32>
    %34 = arith.cmpi slt, %20, %33 : vector<1x256xi32>
    %c255_i32 = arith.constant 255 : i32
    %35 = tpu.dynamic_rotate %25 by %c255_i32 dim 1 : vector<32x256xf32>, i32 -> vector<32x256xf32>
    %cst_15 = arith.constant 0.000000e+00 : f32
    %36 = vector.shape_cast %34 : vector<1x256xi1> to vector<1x256xi1>
    %37 = vector.broadcast %36 : vector<1x256xi1> to vector<32x256xi1>
    %38 = vector.broadcast %cst_15 : f32 to vector<32x256xf32>
    %39 = arith.select %37, %35, %38 : vector<32x256xi1>, vector<32x256xf32>
    %40 = tpu.concatenate %32, %25, %39 in 0 : vector<32x256xf32>, vector<32x256xf32>, vector<32x256xf32> -> vector<96x256xf32>
    %c0_16 = arith.constant 0 : index
    %c0_17 = arith.constant 0 : index
    %c0_18 = arith.constant 0 : index
    %41 = vector.load %arg5[%c0_16, %c0_17, %c0_18] : memref<3x32x96xf32, #tpu.memory_space<vmem>>, vector<1x32x96xf32>
    %42 = vector.shape_cast %41 : vector<1x32x96xf32> to vector<32x96xf32>
    %cst_19 = arith.constant dense<0.000000e+00> : vector<32x256xf32>
    %43 = tpu.matmul %42, %40, %cst_19 {dimension_numbers = #tpu.dot_dimension_numbers<[1], [0], [0], [1], [0, 0, 1, 1], [], []>} : vector<32x96xf32>, vector<96x256xf32>, vector<32x256xf32> -> vector<32x256xf32>
    %c0_20 = arith.constant 0 : index
    %c0_21 = arith.constant 0 : index
    %c0_22 = arith.constant 0 : index
    %c0_23 = arith.constant 0 : index
    %44 = vector.load %arg7[%c0_20, %c0_21, %c0_22, %c0_23] : memref<3x2x32x1xf32, #tpu.memory_space<vmem>>, vector<1x1x32x1xf32>
    %45 = vector.shape_cast %44 : vector<1x1x32x1xf32> to vector<32x1xf32>
    %46 = vector.broadcast %45 : vector<32x1xf32> to vector<32x256xf32>
    %47 = arith.addf %43, %46 : vector<32x256xf32>
    %cst_24 = arith.constant 0.000000e+00 : f32
    %48 = vector.broadcast %cst_24 : f32 to vector<32x256xf32>
    %49 = arith.maximumf %47, %48 : vector<32x256xf32>
    %c0_25 = arith.constant 0 : index
    %c0_26 = arith.constant 0 : index
    %c0_27 = arith.constant 0 : index
    %50 = vector.load %arg6[%c0_25, %c0_26, %c0_27] : memref<3x32x32xf32, #tpu.memory_space<vmem>>, vector<1x32x32xf32>
    %51 = vector.shape_cast %50 : vector<1x32x32xf32> to vector<32x32xf32>
    %cst_28 = arith.constant dense<0.000000e+00> : vector<32x256xf32>
    %52 = tpu.matmul %51, %49, %cst_28 {dimension_numbers = #tpu.dot_dimension_numbers<[1], [0], [0], [1], [0, 0, 1, 1], [], []>} : vector<32x32xf32>, vector<32x256xf32>, vector<32x256xf32> -> vector<32x256xf32>
    %c0_29 = arith.constant 0 : index
    %c1 = arith.constant 1 : index
    %c0_30 = arith.constant 0 : index
    %c0_31 = arith.constant 0 : index
    %53 = vector.load %arg7[%c0_29, %c1, %c0_30, %c0_31] : memref<3x2x32x1xf32, #tpu.memory_space<vmem>>, vector<1x1x32x1xf32>
    %54 = vector.shape_cast %53 : vector<1x1x32x1xf32> to vector<32x1xf32>
    %55 = vector.broadcast %54 : vector<32x1xf32> to vector<32x256xf32>
    %56 = arith.addf %52, %55 : vector<32x256xf32>
    %57 = arith.addf %25, %56 : vector<32x256xf32>
    %58 = vector.broadcast %3 : vector<1x256xf32> to vector<32x256xf32>
    %59 = arith.mulf %57, %58 : vector<32x256xf32>
    %c2_i32 = arith.constant 2 : i32
    %60 = vector.broadcast %c2_i32 : i32 to vector<1x256xi32>
    %61 = arith.cmpi sge, %20, %60 : vector<1x256xi32>
    %c2_i32_32 = arith.constant 2 : i32
    %62 = tpu.dynamic_rotate %59 by %c2_i32_32 dim 1 : vector<32x256xf32>, i32 -> vector<32x256xf32>
    %cst_33 = arith.constant 0.000000e+00 : f32
    %63 = vector.shape_cast %61 : vector<1x256xi1> to vector<1x256xi1>
    %64 = vector.broadcast %63 : vector<1x256xi1> to vector<32x256xi1>
    %65 = vector.broadcast %cst_33 : f32 to vector<32x256xf32>
    %66 = arith.select %64, %62, %65 : vector<32x256xi1>, vector<32x256xf32>
    %c126_i32 = arith.constant 126 : i32
    %67 = vector.broadcast %c126_i32 : i32 to vector<1x256xi32>
    %68 = arith.cmpi slt, %20, %67 : vector<1x256xi32>
    %c254_i32 = arith.constant 254 : i32
    %69 = tpu.dynamic_rotate %59 by %c254_i32 dim 1 : vector<32x256xf32>, i32 -> vector<32x256xf32>
    %cst_34 = arith.constant 0.000000e+00 : f32
    %70 = vector.shape_cast %68 : vector<1x256xi1> to vector<1x256xi1>
    %71 = vector.broadcast %70 : vector<1x256xi1> to vector<32x256xi1>
    %72 = vector.broadcast %cst_34 : f32 to vector<32x256xf32>
    %73 = arith.select %71, %69, %72 : vector<32x256xi1>, vector<32x256xf32>
    %74 = tpu.concatenate %66, %59, %73 in 0 : vector<32x256xf32>, vector<32x256xf32>, vector<32x256xf32> -> vector<96x256xf32>
    %c1_35 = arith.constant 1 : index
    %c0_36 = arith.constant 0 : index
    %c0_37 = arith.constant 0 : index
    %75 = vector.load %arg5[%c1_35, %c0_36, %c0_37] : memref<3x32x96xf32, #tpu.memory_space<vmem>>, vector<1x32x96xf32>
    %76 = vector.shape_cast %75 : vector<1x32x96xf32> to vector<32x96xf32>
    %cst_38 = arith.constant dense<0.000000e+00> : vector<32x256xf32>
    %77 = tpu.matmul %76, %74, %cst_38 {dimension_numbers = #tpu.dot_dimension_numbers<[1], [0], [0], [1], [0, 0, 1, 1], [], []>} : vector<32x96xf32>, vector<96x256xf32>, vector<32x256xf32> -> vector<32x256xf32>
    %c1_39 = arith.constant 1 : index
    %c0_40 = arith.constant 0 : index
    %c0_41 = arith.constant 0 : index
    %c0_42 = arith.constant 0 : index
    %78 = vector.load %arg7[%c1_39, %c0_40, %c0_41, %c0_42] : memref<3x2x32x1xf32, #tpu.memory_space<vmem>>, vector<1x1x32x1xf32>
    %79 = vector.shape_cast %78 : vector<1x1x32x1xf32> to vector<32x1xf32>
    %80 = vector.broadcast %79 : vector<32x1xf32> to vector<32x256xf32>
    %81 = arith.addf %77, %80 : vector<32x256xf32>
    %cst_43 = arith.constant 0.000000e+00 : f32
    %82 = vector.broadcast %cst_43 : f32 to vector<32x256xf32>
    %83 = arith.maximumf %81, %82 : vector<32x256xf32>
    %c1_44 = arith.constant 1 : index
    %c0_45 = arith.constant 0 : index
    %c0_46 = arith.constant 0 : index
    %84 = vector.load %arg6[%c1_44, %c0_45, %c0_46] : memref<3x32x32xf32, #tpu.memory_space<vmem>>, vector<1x32x32xf32>
    %85 = vector.shape_cast %84 : vector<1x32x32xf32> to vector<32x32xf32>
    %cst_47 = arith.constant dense<0.000000e+00> : vector<32x256xf32>
    %86 = tpu.matmul %85, %83, %cst_47 {dimension_numbers = #tpu.dot_dimension_numbers<[1], [0], [0], [1], [0, 0, 1, 1], [], []>} : vector<32x32xf32>, vector<32x256xf32>, vector<32x256xf32> -> vector<32x256xf32>
    %c1_48 = arith.constant 1 : index
    %c1_49 = arith.constant 1 : index
    %c0_50 = arith.constant 0 : index
    %c0_51 = arith.constant 0 : index
    %87 = vector.load %arg7[%c1_48, %c1_49, %c0_50, %c0_51] : memref<3x2x32x1xf32, #tpu.memory_space<vmem>>, vector<1x1x32x1xf32>
    %88 = vector.shape_cast %87 : vector<1x1x32x1xf32> to vector<32x1xf32>
    %89 = vector.broadcast %88 : vector<32x1xf32> to vector<32x256xf32>
    %90 = arith.addf %86, %89 : vector<32x256xf32>
    %91 = arith.addf %59, %90 : vector<32x256xf32>
    %92 = vector.broadcast %3 : vector<1x256xf32> to vector<32x256xf32>
    %93 = arith.mulf %91, %92 : vector<32x256xf32>
    %c4_i32 = arith.constant 4 : i32
    %94 = vector.broadcast %c4_i32 : i32 to vector<1x256xi32>
    %95 = arith.cmpi sge, %20, %94 : vector<1x256xi32>
    %c4_i32_52 = arith.constant 4 : i32
    %96 = tpu.dynamic_rotate %93 by %c4_i32_52 dim 1 : vector<32x256xf32>, i32 -> vector<32x256xf32>
    %cst_53 = arith.constant 0.000000e+00 : f32
    %97 = vector.shape_cast %95 : vector<1x256xi1> to vector<1x256xi1>
    %98 = vector.broadcast %97 : vector<1x256xi1> to vector<32x256xi1>
    %99 = vector.broadcast %cst_53 : f32 to vector<32x256xf32>
    %100 = arith.select %98, %96, %99 : vector<32x256xi1>, vector<32x256xf32>
    %c124_i32 = arith.constant 124 : i32
    %101 = vector.broadcast %c124_i32 : i32 to vector<1x256xi32>
    %102 = arith.cmpi slt, %20, %101 : vector<1x256xi32>
    %c252_i32 = arith.constant 252 : i32
    %103 = tpu.dynamic_rotate %93 by %c252_i32 dim 1 : vector<32x256xf32>, i32 -> vector<32x256xf32>
    %cst_54 = arith.constant 0.000000e+00 : f32
    %104 = vector.shape_cast %102 : vector<1x256xi1> to vector<1x256xi1>
    %105 = vector.broadcast %104 : vector<1x256xi1> to vector<32x256xi1>
    %106 = vector.broadcast %cst_54 : f32 to vector<32x256xf32>
    %107 = arith.select %105, %103, %106 : vector<32x256xi1>, vector<32x256xf32>
    %108 = tpu.concatenate %100, %93, %107 in 0 : vector<32x256xf32>, vector<32x256xf32>, vector<32x256xf32> -> vector<96x256xf32>
    %c2 = arith.constant 2 : index
    %c0_55 = arith.constant 0 : index
    %c0_56 = arith.constant 0 : index
    %109 = vector.load %arg5[%c2, %c0_55, %c0_56] : memref<3x32x96xf32, #tpu.memory_space<vmem>>, vector<1x32x96xf32>
    %110 = vector.shape_cast %109 : vector<1x32x96xf32> to vector<32x96xf32>
    %cst_57 = arith.constant dense<0.000000e+00> : vector<32x256xf32>
    %111 = tpu.matmul %110, %108, %cst_57 {dimension_numbers = #tpu.dot_dimension_numbers<[1], [0], [0], [1], [0, 0, 1, 1], [], []>} : vector<32x96xf32>, vector<96x256xf32>, vector<32x256xf32> -> vector<32x256xf32>
    %c2_58 = arith.constant 2 : index
    %c0_59 = arith.constant 0 : index
    %c0_60 = arith.constant 0 : index
    %c0_61 = arith.constant 0 : index
    %112 = vector.load %arg7[%c2_58, %c0_59, %c0_60, %c0_61] : memref<3x2x32x1xf32, #tpu.memory_space<vmem>>, vector<1x1x32x1xf32>
    %113 = vector.shape_cast %112 : vector<1x1x32x1xf32> to vector<32x1xf32>
    %114 = vector.broadcast %113 : vector<32x1xf32> to vector<32x256xf32>
    %115 = arith.addf %111, %114 : vector<32x256xf32>
    %cst_62 = arith.constant 0.000000e+00 : f32
    %116 = vector.broadcast %cst_62 : f32 to vector<32x256xf32>
    %117 = arith.maximumf %115, %116 : vector<32x256xf32>
    %c2_63 = arith.constant 2 : index
    %c0_64 = arith.constant 0 : index
    %c0_65 = arith.constant 0 : index
    %118 = vector.load %arg6[%c2_63, %c0_64, %c0_65] : memref<3x32x32xf32, #tpu.memory_space<vmem>>, vector<1x32x32xf32>
    %119 = vector.shape_cast %118 : vector<1x32x32xf32> to vector<32x32xf32>
    %cst_66 = arith.constant dense<0.000000e+00> : vector<32x256xf32>
    %120 = tpu.matmul %119, %117, %cst_66 {dimension_numbers = #tpu.dot_dimension_numbers<[1], [0], [0], [1], [0, 0, 1, 1], [], []>} : vector<32x32xf32>, vector<32x256xf32>, vector<32x256xf32> -> vector<32x256xf32>
    %c2_67 = arith.constant 2 : index
    %c1_68 = arith.constant 1 : index
    %c0_69 = arith.constant 0 : index
    %c0_70 = arith.constant 0 : index
    %121 = vector.load %arg7[%c2_67, %c1_68, %c0_69, %c0_70] : memref<3x2x32x1xf32, #tpu.memory_space<vmem>>, vector<1x1x32x1xf32>
    %122 = vector.shape_cast %121 : vector<1x1x32x1xf32> to vector<32x1xf32>
    %123 = vector.broadcast %122 : vector<32x1xf32> to vector<32x256xf32>
    %124 = arith.addf %120, %123 : vector<32x256xf32>
    %125 = arith.addf %93, %124 : vector<32x256xf32>
    %126 = vector.broadcast %3 : vector<1x256xf32> to vector<32x256xf32>
    %127 = arith.mulf %125, %126 : vector<32x256xf32>
    %c0_71 = arith.constant 0 : index
    %c0_72 = arith.constant 0 : index
    %128 = vector.load %arg8[%c0_71, %c0_72] : memref<8x32xf32, #tpu.memory_space<vmem>>, vector<8x32xf32>
    %cst_73 = arith.constant dense<0.000000e+00> : vector<8x256xf32>
    %129 = tpu.matmul %128, %127, %cst_73 {dimension_numbers = #tpu.dot_dimension_numbers<[1], [0], [0], [1], [0, 0, 1, 1], [], []>} : vector<8x32xf32>, vector<32x256xf32>, vector<8x256xf32> -> vector<8x256xf32>
    %c0_74 = arith.constant 0 : index
    %c0_75 = arith.constant 0 : index
    %130 = vector.load %arg9[%c0_74, %c0_75] : memref<8x1xf32, #tpu.memory_space<vmem>>, vector<8x1xf32>
    %131 = vector.broadcast %130 : vector<8x1xf32> to vector<8x256xf32>
    %132 = arith.addf %129, %131 : vector<8x256xf32>
    %133 = vector.broadcast %3 : vector<1x256xf32> to vector<8x256xf32>
    %134 = arith.mulf %132, %133 : vector<8x256xf32>
    %c0_76 = arith.constant 0 : index
    %c0_77 = arith.constant 0 : index
    %c0_78 = arith.constant 0 : index
    %135 = vector.load %arg10[%c0_76, %c0_77, %c0_78] : memref<1x8x256xf32, #tpu.memory_space<vmem>>, vector<1x8x256xf32>
    %136 = vector.shape_cast %135 : vector<1x8x256xf32> to vector<8x256xf32>
    %137 = vector.shape_cast %134 : vector<8x256xf32> to vector<1x8x256xf32>
    tpu.vector_store %arg10[%c0_76, %c0_77, %c0_78], %137 {strides = array<i32>} : memref<1x8x256xf32, #tpu.memory_space<vmem>>, vector<1x8x256xf32>,
    return
  }
  func.func @transform_0(%arg0: i32) -> (i32, i32, i32) {
    %c0_i32 = arith.constant 0 : i32
    %c0_i32_0 = arith.constant 0 : i32
    %c0_i32_1 = arith.constant 0 : i32
    return %arg0, %c0_i32, %c0_i32_0 : i32, i32, i32
  }
  func.func @transform_1(%arg0: i32) -> (i32, i32, i32) {
    %c0_i32 = arith.constant 0 : i32
    %c0_i32_0 = arith.constant 0 : i32
    %c0_i32_1 = arith.constant 0 : i32
    return %arg0, %c0_i32, %c0_i32_0 : i32, i32, i32
  }
  func.func @transform_2(%arg0: i32) -> (i32, i32) {
    %c0_i32 = arith.constant 0 : i32
    %c0_i32_0 = arith.constant 0 : i32
    %c0_i32_1 = arith.constant 0 : i32
    return %c0_i32, %c0_i32_0 : i32, i32
  }
  func.func @transform_3(%arg0: i32) -> (i32, i32) {
    %c0_i32 = arith.constant 0 : i32
    %c0_i32_0 = arith.constant 0 : i32
    %c0_i32_1 = arith.constant 0 : i32
    return %c0_i32, %c0_i32_0 : i32, i32
  }
  func.func @transform_4(%arg0: i32) -> (i32, i32, i32) {
    %c0_i32 = arith.constant 0 : i32
    %c0_i32_0 = arith.constant 0 : i32
    %c0_i32_1 = arith.constant 0 : i32
    %c0_i32_2 = arith.constant 0 : i32
    return %c0_i32, %c0_i32_0, %c0_i32_1 : i32, i32, i32
  }
  func.func @transform_5(%arg0: i32) -> (i32, i32, i32) {
    %c0_i32 = arith.constant 0 : i32
    %c0_i32_0 = arith.constant 0 : i32
    %c0_i32_1 = arith.constant 0 : i32
    %c0_i32_2 = arith.constant 0 : i32
    return %c0_i32, %c0_i32_0, %c0_i32_1 : i32, i32, i32
  }
  func.func @transform_6(%arg0: i32) -> (i32, i32, i32, i32) {
    %c0_i32 = arith.constant 0 : i32
    %c0_i32_0 = arith.constant 0 : i32
    %c0_i32_1 = arith.constant 0 : i32
    %c0_i32_2 = arith.constant 0 : i32
    %c0_i32_3 = arith.constant 0 : i32
    return %c0_i32, %c0_i32_0, %c0_i32_1, %c0_i32_2 : i32, i32, i32, i32
  }
  func.func @transform_7(%arg0: i32) -> (i32, i32) {
    %c0_i32 = arith.constant 0 : i32
    %c0_i32_0 = arith.constant 0 : i32
    %c0_i32_1 = arith.constant 0 : i32
    return %c0_i32, %c0_i32_0 : i32, i32
  }
  func.func @transform_8(%arg0: i32) -> (i32, i32) {
    %c0_i32 = arith.constant 0 : i32
    %c0_i32_0 = arith.constant 0 : i32
    %c0_i32_1 = arith.constant 0 : i32
    return %c0_i32, %c0_i32_0 : i32, i32
  }
  func.func @transform_9(%arg0: i32) -> (i32, i32, i32) {
    %c0_i32 = arith.constant 0 : i32
    %c0_i32_0 = arith.constant 0 : i32
    %c0_i32_1 = arith.constant 0 : i32
    return %arg0, %c0_i32, %c0_i32_0 : i32, i32, i32
  }
}

</mosaic_0001>

<bundles_post_ra>
// kernel: tpu_custom_call.1
= control target key start
LH: loop header
LB: loop body
LE: loop exit
PB: predicated region body
PF: predicated region fallthrough
CT: control target
= control target key end

     0   :  { %vm91_vm0 = vcmask 64512   ;;  %v1321_v5 = vmov 0   ;;  %s2025_s0 = inlined_call_operand.vmem [shape: f32[1,8,256], index: 0, kind: input, shape index: {}]   ;;  %s2026_s1 = inlined_call_operand.vmem [shape: f32[1,1,256], index: 1, kind: input, shape index: {}]   ;;  %s2027_s2 = inlined_call_operand.vmem [shape: f32[32,8], index: 2, kind: input, shape index: {}]   ;;  %s2028_s3 = inlined_call_operand.vmem [shape: f32[32,1], index: 3, kind: input, shape index: {}]   ;;  %s2029_s4 = inlined_call_operand.vmem [shape: f32[3,32,96], index: 4, kind: input, shape index: {}]   ;;  %s2030_s5 = inlined_call_operand.vmem [shape: f32[3,32,32], index: 5, kind: input, shape index: {}]   ;;  %s2031_s6 = inlined_call_operand.vmem [shape: f32[3,2,32,1], index: 6, kind: input, shape index: {}]   ;;  %s2032_s7 = inlined_call_operand.vmem [shape: f32[8,32], index: 7, kind: input, shape index: {}]   ;;  %s2033_s8 = inlined_call_operand.vmem [shape: f32[8,1], index: 8, kind: input, shape index: {}]   ;;  %s2034_s9 = inlined_call_operand.hbm [shape: f32[1,8,256], index: 9, kind: output, shape index: {}]  }
   0x1   :  { %v33_v0 = vld [vmem:[%s2025_s0] sm:$0xff]  ;;  %v34_v1 = vld [vmem:[%s2025_s0 + $0x8] sm:$0xff]  ;;  %v70_v4 = vld [vmem:[%s2028_s3 + $0x18] sm:$0xff]  ;;  %1293 = vset.pattern.permute.xlu1 %v1321_v5  ;;  %1292 = vset.pattern.permute.xlu0 %v1321_v5 }
   0x2   :  { %v63_v2 = vld [vmem:[%s2027_s2] sm:$0xff]  ;;  %119 = vmatpush.msra.mxu0 %v33_v0  ;;  %148 = vmatpush.msra.mxu1 %v34_v1  ;;  %v68_v3 = vld [vmem:[%s2028_s3 + $0x8] sm:$0xff] }
   0x3   :  { %1142 = vmatmul.msk.f32.vlgmr.msra.gmra.mxu0 %vm91_vm0, %v63_v2  ;;  %1146 = vmatmul.msk.f32.vlgmr.msra.gmra.mxu1 %vm91_vm0, %v63_v2 }
   0x4   :  { %14 = vsyncpa [#allocation3], 0  ;;  %78 = vperm.xlu1 %1293, %v68_v3   ;;  %88 = vperm.xlu0 %1292, %v70_v4   ;;  %v64_v6 = vld [vmem:[%s2027_s2 + $0x8] sm:$0xff]  ;;  %v67_v7 = vld [vmem:[%s2028_s3] sm:$0xff]  ;;  %v36_v36 = vlaneseq  ;;  %vm268_vm6 = vcmask 785408   ;;  %vm376_vm7 = vcmask 261120  }
   0x5   :  { %1294 = vset.pattern.permute.xlu2 %v1321_v5  ;;  %v69_v8 = vld [vmem:[%s2028_s3 + $0x10] sm:$0xff]  ;;  %v66_v10 = vld [vmem:[%s2027_s2 + $0x18] sm:$0xff]  ;;  %s1322_s3 = smov 127   ;;  %v245_v32 = vld [vmem:[%s2031_s6 + $0x8] sm:$0xff]  ;;  %s1324_s17 = smov 126  }
   0x6   :  { %v65_v9 = vld [vmem:[%s2027_s2 + $0x10] sm:$0xff]  ;;  %s1323_s2 = smov 1   ;;  %v1177_v33 = vld [vmem:[%s2031_s6 + $0x38] sm:$0xff]  ;;  %v1174_v35 = vld [vmem:[%s2031_s6 + $0x20] sm:$0xff]  ;;  %v1464_v38 = vand.u32 127, %v36_v36  ;;  %s1326_s24 = smov 124  }
   0x7   :  { %v246_v31 = vld [vmem:[%s2031_s6 + $0x10] sm:$0xff]  ;;  %v247_v2 = vld [vmem:[%s2031_s6 + $0x18] sm:$0xff]  ;;  %s1327_s25 = smov 4   ;;  %s1328_s10 = smov [#allocation2]  }
   0x8   :  { %v1176_v34 = vld [vmem:[%s2031_s6 + $0x30] sm:$0xff]  ;;  %v38_v39 = vadd.s32 128, %v1464_v38  ;;  %vm201_vm1 = vcmp.lt.s32.totalorder %v1464_v38, 127  ;;  %vm162_vm3 = vcmp.ge.s32.totalorder %v1464_v38, 1  ;;  %vm180_vm5 = vcmp.lt.s32.totalorder %v1464_v38, 1  ;;  %s1131_s11 = sshll.u32 %s1328_s10, 4  ;;  %s1132_s11 = int_to_ptr.vmem [resolvable:$true] %s1131_s11 }
   0x9   :  { %vm507_vm9 = vcmp.lt.s32.totalorder %v1464_v38, 126  ;;  %vm468_vm10 = vcmp.ge.s32.totalorder %v1464_v38, 2  ;;  %vm486_vm12 = vcmp.lt.s32.totalorder %v1464_v38, 2  ;;  %vm809_vm14 = vcmp.lt.s32.totalorder %v1464_v38, 124  ;;  %s1133_s14 = sshll.u32 %s2034_s9, 4  ;;  %s1134_s14 = int_to_ptr.hbm [resolvable:$true] %s1133_s14 }
   0xa   :  { %v1467_v41 = vand.u32 127, %v38_v39  ;;  %vm770_vm15 = vcmp.ge.s32.totalorder %v1464_v38, 4 }
   0xb   :  { %1143 = vmatmul.msk.f32.gmra.mxu0 %vm91_vm0, %v64_v6  ;;  %1147 = vmatmul.msk.f32.gmra.mxu1 %vm91_vm0, %v64_v6 }
   0xc   :  { %73 = vperm.xlu1 %1293, %v67_v7   ;;  %83 = vperm.xlu0 %1292, %v69_v8   ;;  %vm202_vm2 = vcmp.lt.s32.totalorder %v1467_v41, 127  ;;  %vm163_vm4 = vcmp.ge.s32.totalorder %v1467_v41, 1  ;;  %v240_v7 = vld [vmem:[%s2029_s4] sm:$0xff]  ;;  %vm508_vm8 = vcmp.lt.s32.totalorder %v1467_v41, 126  ;;  %vm469_vm11 = vcmp.ge.s32.totalorder %v1467_v41, 2 }
   0xd   :  { %vm810_vm13 = vcmp.lt.s32.totalorder %v1467_v41, 124 }
  0x13   :  { %1144 = vmatmul.msk.f32.gmra.mxu0 %vm91_vm0, %v65_v9  ;;  %1148 = vmatmul.msk.f32.gmra.mxu1 %vm91_vm0, %v65_v9 }
  0x1b   :  { %1145 = vmatmul.msk.f32.gmra.mxu0 %vm91_vm0, %v66_v10  ;;  %1149 = vmatmul.msk.f32.gmra.mxu1 %vm91_vm0, %v66_v10  ;;  %v244_v10 = vld [vmem:[%s2031_s6] sm:$0xff]  ;;  %vm771_vm0 = vcmp.ge.s32.totalorder %v1467_v41, 4  ;;  %v1237_v41 = vld [vmem:[%s2029_s4 + $0x58] sm:$0xff] }
  0x76   :  { %v79_v11 = vpop.permute.xlu1 %78  ;;  %v89_v16 = vpop.permute.xlu0 %88 }
  0x7e   :  { %v74_v12 = vpop.permute.xlu1 %73  ;;  %v84_v21 = vpop.permute.xlu0 %83 }
  0x80   :  { %v121_v13 = vpop.f32.mrf.mxu0  ;;  %v150_v14 = vpop.f32.mrf.mxu1 }
  0x81   :  { %v1417_v15 = vadd.f32 %v121_v13, %v74_v12  ;;  %v1442_v30 = vadd.f32 %v150_v14, %v74_v12  ;;  %v1175_v12 = vld [vmem:[%s2031_s6 + $0x28] sm:$0xff]  ;;  %v242_v13 = vld [vmem:[%s2029_s4 + $0x10] sm:$0xff]  ;;  %v243_v14 = vld [vmem:[%s2029_s4 + $0x18] sm:$0xff] }
  0x83   :  { %203 = vrot.lane.b32.xlu1 %v1417_v15, %s1322_s3 }
  0x88   :  { %v124_v17 = vpop.f32.mrf.mxu0  ;;  %v153_v18 = vpop.f32.mrf.mxu1 }
  0x89   :  { %v1420_v19 = vadd.f32 %v124_v17, %v79_v11  ;;  %v1422_v20 = vadd.f32 %v153_v18, %v79_v11  ;;  %v241_v11 = vld [vmem:[%s2029_s4 + $0x8] sm:$0xff] }
  0x8b   :  { %213 = vrot.lane.b32.xlu0 %v1422_v20, %s1322_s3  ;;  %205 = vrot.lane.b32.xlu2 %v1420_v19, %s1322_s3 }
  0x90   :  { %v127_v22 = vpop.f32.mrf.mxu0  ;;  %v156_v23 = vpop.f32.mrf.mxu1 }
  0x91   :  { %v1426_v24 = vadd.f32 %v127_v22, %v84_v21  ;;  %v1428_v25 = vadd.f32 %v156_v23, %v84_v21 }
  0x93   :  { %207 = vrot.lane.b32.xlu0 %v1426_v24, %s1322_s3  ;;  %215 = vrot.lane.b32.xlu1 %v1428_v25, %s1322_s3 }
  0x98   :  { %v130_v26 = vpop.f32.mrf.mxu0  ;;  %v159_v28 = vpop.f32.mrf.mxu1 }
  0x99   :  { %v1432_v27 = vadd.f32 %v130_v26, %v89_v16  ;;  %v1437_v29 = vadd.f32 %v159_v28, %v89_v16 }
  0x9b   :  { %176 = vrot.lane.b32.xlu0 %v1428_v25, %s1323_s2  ;;  %209 = vrot.lane.b32.xlu2 %v1432_v27, %s1322_s3 }
  0x9c   :  { %166 = vrot.lane.b32.xlu1 %v1420_v19, %s1323_s2 }
  0xa3   :  { %170 = vrot.lane.b32.xlu0 %v1432_v27, %s1323_s2  ;;  %217 = vrot.lane.b32.xlu2 %v1437_v29, %s1322_s3 }
  0xa4   :  { %178 = vrot.lane.b32.xlu1 %v1437_v29, %s1323_s2 }
  0xab   :  { %211 = vrot.lane.b32.xlu2 %v1442_v30, %s1322_s3  ;;  %164 = vrot.lane.b32.xlu0 %v1417_v15, %s1323_s2 }
  0xac   :  { %172 = vrot.lane.b32.xlu1 %v1442_v30, %s1323_s2 }
  0xb3   :  { %168 = vrot.lane.b32.xlu2 %v1426_v24, %s1323_s2  ;;  %260 = vperm.xlu0 %1292, %v246_v31  }
  0xb4   :  { %255 = vperm.xlu1 %1293, %v245_v32  }
  0xbb   :  { %174 = vrot.lane.b32.xlu2 %v1422_v20, %s1323_s2  ;;  %373 = vperm.xlu0 %1292, %v1177_v33  }
  0xbc   :  { %368 = vperm.xlu1 %1293, %v1176_v34  }
  0xc3   :  { %358 = vperm.xlu0 %1292, %v1174_v35   ;;  %265 = vperm.xlu2 %1294, %v247_v2  }
  0xcb   :  { %250 = vperm.xlu2 %1294, %v244_v10  }
  0xd3   :  { %363 = vperm.xlu2 %1294, %v1175_v12  }
  0xe5   :  { %v206_v37 = vpop.permute.xlu2 %205 }
  0xf5   :  { %v210_v40 = vpop.permute.xlu2 %209  ;;  %v204_v44 = vpop.permute.xlu1 %203 }
  0xfd   :  { %v214_v42 = vpop.permute.xlu0 %213  ;;  %v218_v43 = vpop.permute.xlu2 %217 }
  0xfe   :  { %v223_v45 = vsel %vm201_vm1, %v210_v40, %v218_v43  ;;  %v227_v46 = vsel %vm201_vm1, %v218_v43, %v210_v40  ;;  %v221_v52 = vsel %vm201_vm1, %v206_v37, %v214_v42  ;;  %v225_v53 = vsel %vm201_vm1, %v214_v42, %v206_v37 }
  0xff   :  { %1150 = vmatpush.msk.msra.mxu2 %vm201_vm1, %v223_v45  ;;  %1162 = vmatpush.msk.msra.mxu3 %vm202_vm2, %v227_v46 }
 0x105   :  { %v208_v47 = vpop.permute.xlu0 %207  ;;  %v212_v48 = vpop.permute.xlu2 %211 }
 0x106   :  { %v216_v49 = vpop.permute.xlu1 %215  ;;  %v220_v54 = vsel %vm201_vm1, %v204_v44, %v212_v48  ;;  %v224_v55 = vsel %vm201_vm1, %v212_v48, %v204_v44 }
 0x107   :  { %v222_v50 = vsel %vm201_vm1, %v208_v47, %v216_v49  ;;  %v226_v51 = vsel %vm201_vm1, %v216_v49, %v208_v47 }
 0x108   :  { %1151 = vmatpush.msk.msra.mxu2 %vm201_vm1, %v222_v50  ;;  %1163 = vmatpush.msk.msra.mxu3 %vm202_vm2, %v226_v51 }
 0x10a   :  { %1152 = vmatpush.msk.msra.mxu2 %vm201_vm1, %v221_v52  ;;  %1164 = vmatpush.msk.msra.mxu3 %vm202_vm2, %v225_v53  ;;  %v347_v53 = vld [vmem:[%s2030_s5] sm:$0xff] }
 0x10c   :  { %1153 = vmatpush.msk.msra.mxu2 %vm201_vm1, %v220_v54  ;;  %1165 = vmatpush.msk.msra.mxu3 %vm202_vm2, %v224_v55  ;;  %v348_v54 = vld [vmem:[%s2030_s5 + $0x8] sm:$0xff]  ;;  %v349_v55 = vld [vmem:[%s2030_s5 + $0x10] sm:$0xff]  ;;  %vm788_vm1 = vcmp.lt.s32.totalorder %v1464_v38, 4 }
 0x10d   :  { %v177_v56 = vpop.permute.xlu0 %176  ;;  %v169_v57 = vpop.permute.xlu2 %168  ;;  %v1236_v38 = vld [vmem:[%s2029_s4 + $0x50] sm:$0xff] }
 0x10e   :  { %289 = vmatpush.msra.mxu2 %v1432_v27  ;;  %318 = vmatpush.msra.mxu3 %v1437_v29  ;;  %v167_v58 = vpop.permute.xlu1 %166  ;;  %v187_v0 = vsel %vm180_vm5, %v177_v56, %v169_v57  ;;  %v183_v1 = vsel %vm180_vm5, %v169_v57, %v177_v56  ;;  %v350_v56 = vld [vmem:[%s2030_s5 + $0x18] sm:$0xff] }
 0x110   :  { %290 = vmatpush.msra.mxu2 %v1426_v24  ;;  %319 = vmatpush.msra.mxu3 %v1428_v25 }
 0x112   :  { %291 = vmatpush.msra.mxu2 %v1420_v19  ;;  %320 = vmatpush.msra.mxu3 %v1422_v20 }
 0x114   :  { %292 = vmatpush.msra.mxu2 %v1417_v15  ;;  %321 = vmatpush.msra.mxu3 %v1442_v30 }
 0x115   :  { %v171_v59 = vpop.permute.xlu0 %170  ;;  %v175_v63 = vpop.permute.xlu2 %174 }
 0x116   :  { %v179_v60 = vpop.permute.xlu1 %178  ;;  %v186_v3 = vsel %vm180_vm5, %v175_v63, %v167_v58  ;;  %v182_v4 = vsel %vm180_vm5, %v167_v58, %v175_v63  ;;  %v35_v58 = vld [vmem:[%s2026_s1] sm:$0x3]  ;;  %s1325_s1 = smov 2  }
 0x117   :  { %v188_v61 = vsel %vm180_vm5, %v179_v60, %v171_v59  ;;  %v184_v62 = vsel %vm180_vm5, %v171_v59, %v179_v60  ;;  %v1598_v63 = vperm.slane %v35_v58, 0 }
 0x118   :  { %1154 = vmatpush.msk.msra.mxu2 %vm162_vm3, %v188_v61  ;;  %1166 = vmatpush.msk.msra.mxu3 %vm163_vm4, %v184_v62 }
 0x11a   :  { %1155 = vmatpush.msk.msra.mxu2 %vm162_vm3, %v187_v0  ;;  %1167 = vmatpush.msk.msra.mxu3 %vm163_vm4, %v183_v1 }
 0x11c   :  { %1156 = vmatpush.msk.msra.mxu2 %vm162_vm3, %v186_v3  ;;  %1168 = vmatpush.msk.msra.mxu3 %vm163_vm4, %v182_v4 }
 0x11d   :  { %v165_v5 = vpop.permute.xlu0 %164  ;;  %v266_v22 = vpop.permute.xlu2 %265 }
 0x11e   :  { %v173_v6 = vpop.permute.xlu1 %172 }
 0x11f   :  { %v185_v8 = vsel %vm180_vm5, %v173_v6, %v165_v5  ;;  %v181_v9 = vsel %vm180_vm5, %v165_v5, %v173_v6 }
 0x120   :  { %1157 = vmatpush.msk.msra.mxu2 %vm162_vm3, %v185_v8  ;;  %1169 = vmatpush.msk.msra.mxu3 %vm163_vm4, %v181_v9 }
 0x121   :  { %1158 = vmatmul.msk.f32.vlgmr.msra.gmra.mxu2 %vm268_vm6, %v240_v7  ;;  %1170 = vmatmul.msk.f32.vlgmr.msra.gmra.mxu3 %vm268_vm6, %v240_v7  ;;  %v1606_v7 = vperm.slane %v35_v58, 1 }
 0x125   :  { %v261_v28 = vpop.permute.xlu0 %260  ;;  %v251_v39 = vpop.permute.xlu2 %250 }
 0x126   :  { %v256_v37 = vpop.permute.xlu1 %255 }
 0x129   :  { %1159 = vmatmul.msk.f32.gmra.mxu2 %vm268_vm6, %v241_v11  ;;  %1171 = vmatmul.msk.f32.gmra.mxu3 %vm268_vm6, %v241_v11 }
 0x12d   :  { %v374_v57 = vpop.permute.xlu0 %373  ;;  %v364_v2 = vpop.permute.xlu2 %363 }
 0x12e   :  { %v369_v11 = vpop.permute.xlu1 %368 }
 0x131   :  { %1160 = vmatmul.msk.f32.gmra.mxu2 %vm268_vm6, %v242_v13  ;;  %1172 = vmatmul.msk.f32.gmra.mxu3 %vm268_vm6, %v242_v13 }
 0x135   :  { %v359_v59 = vpop.permute.xlu0 %358 }
 0x139   :  { %1161 = vmatmul.msk.f32.gmra.mxu2 %vm268_vm6, %v243_v14  ;;  %1173 = vmatmul.msk.f32.gmra.mxu3 %vm268_vm6, %v243_v14 }
 0x1a4   :  { %v298_v16 = vpop.f32.mrf.mxu2  ;;  %v327_v17 = vpop.f32.mrf.mxu3 }
 0x1a5   :  { %v299_v45 = vadd.f32 %v298_v16, %v251_v39  ;;  %v328_v46 = vadd.f32 %v327_v17, %v251_v39  ;;  %v1222_v39 = vld [vmem:[%s2031_s6 + $0x60] sm:$0xff] }
 0x1a7   :  { %v339_v51 = vmax.f32 %v299_v45, 0.0  ;;  %v340_v52 = vmax.f32 %v328_v46, 0.0 }
 0x1ac   :  { %v301_v18 = vpop.f32.mrf.mxu2  ;;  %v330_v21 = vpop.f32.mrf.mxu3 }
 0x1ad   :  { %v302_v40 = vadd.f32 %v301_v18, %v256_v37  ;;  %v331_v42 = vadd.f32 %v330_v21, %v256_v37  ;;  %v1190_v37 = vld [vmem:[%s2031_s6 + $0x40] sm:$0xff] }
 0x1af   :  { %v341_v49 = vmax.f32 %v302_v40, 0.0  ;;  %v342_v50 = vmax.f32 %v331_v42, 0.0  ;;  %v1223_v40 = vld [vmem:[%s2031_s6 + $0x68] sm:$0xff] }
 0x1b4   :  { %v304_v23 = vpop.f32.mrf.mxu2  ;;  %v333_v26 = vpop.f32.mrf.mxu3 }
 0x1b5   :  { %v305_v33 = vadd.f32 %v304_v23, %v261_v28  ;;  %v334_v34 = vadd.f32 %v333_v26, %v261_v28 }
 0x1b7   :  { %v343_v47 = vmax.f32 %v305_v33, 0.0  ;;  %v344_v48 = vmax.f32 %v334_v34, 0.0  ;;  %v1191_v33 = vld [vmem:[%s2031_s6 + $0x48] sm:$0xff]  ;;  %v1193_v34 = vld [vmem:[%s2031_s6 + $0x58] sm:$0xff] }
 0x1bc   :  { %v307_v31 = vpop.f32.mrf.mxu2  ;;  %v336_v32 = vpop.f32.mrf.mxu3 }
 0x1bd   :  { %v308_v35 = vadd.f32 %v307_v31, %v266_v22  ;;  %v337_v36 = vadd.f32 %v336_v32, %v266_v22 }
 0x1bf   :  { %v345_v43 = vmax.f32 %v308_v35, 0.0  ;;  %v346_v44 = vmax.f32 %v337_v36, 0.0  ;;  %v1225_v35 = vld [vmem:[%s2031_s6 + $0x78] sm:$0xff]  ;;  %v1224_v36 = vld [vmem:[%s2031_s6 + $0x70] sm:$0xff] }
 0x1c1   :  { %401 = vmatpush.msrb.mxu0 %v345_v43  ;;  %430 = vmatpush.msrb.mxu1 %v346_v44 }
 0x1c3   :  { %402 = vmatpush.msrb.mxu0 %v343_v47  ;;  %431 = vmatpush.msrb.mxu1 %v344_v48 }
 0x1c5   :  { %403 = vmatpush.msrb.mxu0 %v341_v49  ;;  %432 = vmatpush.msrb.mxu1 %v342_v50 }
 0x1c7   :  { %404 = vmatpush.msrb.mxu0 %v339_v51  ;;  %433 = vmatpush.msrb.mxu1 %v340_v52 }
 0x1c8   :  { %1178 = vmatmul.msk.f32.vlgmr.msrb.gmra.mxu0 %vm376_vm7, %v347_v53  ;;  %1182 = vmatmul.msk.f32.vlgmr.msrb.gmra.mxu1 %vm376_vm7, %v347_v53 }
 0x1d0   :  { %1179 = vmatmul.msk.f32.gmra.mxu0 %vm376_vm7, %v348_v54  ;;  %1183 = vmatmul.msk.f32.gmra.mxu1 %vm376_vm7, %v348_v54 }
 0x1d8   :  { %1180 = vmatmul.msk.f32.gmra.mxu0 %vm376_vm7, %v349_v55  ;;  %1184 = vmatmul.msk.f32.gmra.mxu1 %vm376_vm7, %v349_v55 }
 0x1e0   :  { %1181 = vmatmul.msk.f32.gmra.mxu0 %vm376_vm7, %v350_v56  ;;  %1185 = vmatmul.msk.f32.gmra.mxu1 %vm376_vm7, %v350_v56 }
 0x245   :  { %v406_v60 = vpop.f32.mrf.mxu0  ;;  %v435_v61 = vpop.f32.mrf.mxu1 }
 0x246   :  { %v407_v62 = vadd.f32 %v406_v60, %v359_v59  ;;  %v436_v28 = vadd.f32 %v435_v61, %v359_v59 }
 0x248   :  { %v447_v0 = vadd.f32 %v407_v62, %v1417_v15 }
 0x24a   :  { %v1602_v1 = vmul.f32 %v1598_v63, %v447_v0 }
 0x24c   :  { %509 = vrot.lane.b32.xlu1 %v1602_v1, %s1324_s17 }
 0x24d   :  { %v409_v3 = vpop.f32.mrf.mxu0  ;;  %v438_v4 = vpop.f32.mrf.mxu1 }
 0x24e   :  { %v410_v5 = vadd.f32 %v409_v3, %v364_v2  ;;  %v439_v6 = vadd.f32 %v438_v4, %v364_v2 }
 0x250   :  { %v449_v8 = vadd.f32 %v410_v5, %v1420_v19  ;;  %v450_v9 = vadd.f32 %v439_v6, %v1422_v20 }
 0x252   :  { %v1611_v15 = vmul.f32 %v1598_v63, %v449_v8  ;;  %v1614_v10 = vmul.f32 %v1606_v7, %v450_v9 }
 0x254   :  { %519 = vrot.lane.b32.xlu0 %v1614_v10, %s1324_s17  ;;  %511 = vrot.lane.b32.xlu2 %v1611_v15, %s1324_s17 }
 0x255   :  { %v412_v12 = vpop.f32.mrf.mxu0  ;;  %v441_v13 = vpop.f32.mrf.mxu1 }
 0x256   :  { %v413_v14 = vadd.f32 %v412_v12, %v369_v11  ;;  %v442_v16 = vadd.f32 %v441_v13, %v369_v11  ;;  %v1186_v12 = vld [vmem:[%s2029_s4 + $0x20] sm:$0xff] }
 0x258   :  { %v451_v19 = vadd.f32 %v413_v14, %v1426_v24  ;;  %v452_v20 = vadd.f32 %v442_v16, %v1428_v25  ;;  %v1187_v16 = vld [vmem:[%s2029_s4 + $0x28] sm:$0xff] }
 0x25a   :  { %v1623_v17 = vmul.f32 %v1598_v63, %v451_v19  ;;  %v1626_v18 = vmul.f32 %v1606_v7, %v452_v20  ;;  %v1188_v19 = vld [vmem:[%s2029_s4 + $0x30] sm:$0xff]  ;;  %v1189_v20 = vld [vmem:[%s2029_s4 + $0x38] sm:$0xff] }
 0x25c   :  { %521 = vrot.lane.b32.xlu1 %v1626_v18, %s1324_s17  ;;  %513 = vrot.lane.b32.xlu0 %v1623_v17, %s1324_s17 }
 0x25d   :  { %v415_v21 = vpop.f32.mrf.mxu0  ;;  %v444_v22 = vpop.f32.mrf.mxu1 }
 0x25e   :  { %v416_v23 = vadd.f32 %v415_v21, %v374_v57  ;;  %v445_v26 = vadd.f32 %v444_v22, %v374_v57 }
 0x260   :  { %v453_v24 = vadd.f32 %v416_v23, %v1432_v27  ;;  %v454_v25 = vadd.f32 %v445_v26, %v1437_v29  ;;  %v448_v27 = vadd.f32 %v436_v28, %v1442_v30  ;;  %v1192_v30 = vld [vmem:[%s2031_s6 + $0x50] sm:$0xff] }
 0x262   :  { %v1635_v31 = vmul.f32 %v1598_v63, %v453_v24  ;;  %v1638_v32 = vmul.f32 %v1606_v7, %v454_v25  ;;  %v1647_v29 = vmul.f32 %v1606_v7, %v448_v27 }
 0x264   :  { %523 = vrot.lane.b32.xlu2 %v1638_v32, %s1324_s17  ;;  %515 = vrot.lane.b32.xlu1 %v1635_v31, %s1324_s17 }
 0x265   :  { %482 = vrot.lane.b32.xlu0 %v1626_v18, %s1325_s1 }
 0x26c   :  { %517 = vrot.lane.b32.xlu2 %v1647_v29, %s1324_s17  ;;  %472 = vrot.lane.b32.xlu1 %v1611_v15, %s1325_s1 }
 0x26d   :  { %476 = vrot.lane.b32.xlu0 %v1635_v31, %s1325_s1 }
 0x274   :  { %484 = vrot.lane.b32.xlu1 %v1638_v32, %s1325_s1  ;;  %474 = vrot.lane.b32.xlu2 %v1623_v17, %s1325_s1 }
 0x275   :  { %470 = vrot.lane.b32.xlu0 %v1602_v1, %s1325_s1 }
 0x27c   :  { %478 = vrot.lane.b32.xlu1 %v1647_v29, %s1325_s1  ;;  %480 = vrot.lane.b32.xlu2 %v1614_v10, %s1325_s1 }
 0x27d   :  { %568 = vperm.xlu0 %1292, %v1192_v30  }
 0x284   :  { %563 = vperm.xlu1 %1293, %v1191_v33   ;;  %573 = vperm.xlu2 %1294, %v1193_v34  }
 0x285   :  { %681 = vperm.xlu0 %1292, %v1225_v35  }
 0x28c   :  { %676 = vperm.xlu1 %1293, %v1224_v36   ;;  %558 = vperm.xlu2 %1294, %v1190_v37  }
 0x28d   :  { %666 = vperm.xlu0 %1292, %v1222_v39  }
 0x294   :  { %671 = vperm.xlu2 %1294, %v1223_v40  }
 0x2ae   :  { %v512_v42 = vpop.permute.xlu2 %511 }
 0x2be   :  { %v510_v43 = vpop.permute.xlu1 %509  ;;  %v524_v45 = vpop.permute.xlu2 %523 }
 0x2c6   :  { %v520_v44 = vpop.permute.xlu0 %519  ;;  %v518_v48 = vpop.permute.xlu2 %517 }
 0x2c7   :  { %v527_v55 = vsel %vm507_vm9, %v512_v42, %v520_v44  ;;  %v531_v56 = vsel %vm507_vm9, %v520_v44, %v512_v42  ;;  %v526_v57 = vsel %vm507_vm9, %v510_v43, %v518_v48  ;;  %v530_v58 = vsel %vm507_vm9, %v518_v48, %v510_v43 }
 0x2ce   :  { %v522_v46 = vpop.permute.xlu1 %521  ;;  %v514_v47 = vpop.permute.xlu0 %513 }
 0x2cf   :  { %v528_v52 = vsel %vm507_vm9, %v514_v47, %v522_v46  ;;  %v532_v53 = vsel %vm507_vm9, %v522_v46, %v514_v47  ;;  %v475_v60 = vpop.permute.xlu2 %474 }
 0x2d6   :  { %v516_v49 = vpop.permute.xlu1 %515 }
 0x2d7   :  { %v529_v50 = vsel %vm507_vm9, %v516_v49, %v524_v45  ;;  %v533_v51 = vsel %vm507_vm9, %v524_v45, %v516_v49  ;;  %v483_v54 = vpop.permute.xlu0 %482  ;;  %v481_v5 = vpop.permute.xlu2 %480 }
 0x2d8   :  { %1194 = vmatpush.msk.msrb.mxu2 %vm507_vm9, %v529_v50  ;;  %1206 = vmatpush.msk.msrb.mxu3 %vm508_vm8, %v533_v51  ;;  %v493_v3 = vsel %vm486_vm12, %v483_v54, %v475_v60  ;;  %v489_v4 = vsel %vm486_vm12, %v475_v60, %v483_v54  ;;  %v1218_v54 = vld [vmem:[%s2030_s5 + $0x20] sm:$0xff] }
 0x2da   :  { %1195 = vmatpush.msk.msrb.mxu2 %vm507_vm9, %v528_v52  ;;  %1207 = vmatpush.msk.msrb.mxu3 %vm508_vm8, %v532_v53 }
 0x2dc   :  { %1196 = vmatpush.msk.msrb.mxu2 %vm507_vm9, %v527_v55  ;;  %1208 = vmatpush.msk.msrb.mxu3 %vm508_vm8, %v531_v56  ;;  %v1219_v55 = vld [vmem:[%s2030_s5 + $0x28] sm:$0xff]  ;;  %v1220_v56 = vld [vmem:[%s2030_s5 + $0x30] sm:$0xff] }
 0x2de   :  { %1197 = vmatpush.msk.msrb.mxu2 %vm507_vm9, %v526_v57  ;;  %1209 = vmatpush.msk.msrb.mxu3 %vm508_vm8, %v530_v58  ;;  %v473_v59 = vpop.permute.xlu1 %472  ;;  %v1221_v57 = vld [vmem:[%s2030_s5 + $0x38] sm:$0xff] }
 0x2df   :  { %v477_v61 = vpop.permute.xlu0 %476  ;;  %v492_v6 = vsel %vm486_vm12, %v481_v5, %v473_v59  ;;  %v488_v8 = vsel %vm486_vm12, %v473_v59, %v481_v5  ;;  %v574_v28 = vpop.permute.xlu2 %573 }
 0x2e0   :  { %596 = vmatpush.msrb.mxu2 %v1635_v31  ;;  %625 = vmatpush.msrb.mxu3 %v1638_v32 }
 0x2e2   :  { %597 = vmatpush.msrb.mxu2 %v1623_v17  ;;  %626 = vmatpush.msrb.mxu3 %v1626_v18 }
 0x2e4   :  { %598 = vmatpush.msrb.mxu2 %v1611_v15  ;;  %627 = vmatpush.msrb.mxu3 %v1614_v10 }
 0x2e6   :  { %599 = vmatpush.msrb.mxu2 %v1602_v1  ;;  %628 = vmatpush.msrb.mxu3 %v1647_v29  ;;  %v485_v62 = vpop.permute.xlu1 %484 }
 0x2e7   :  { %v494_v0 = vsel %vm486_vm12, %v485_v62, %v477_v61  ;;  %v490_v2 = vsel %vm486_vm12, %v477_v61, %v485_v62  ;;  %v471_v9 = vpop.permute.xlu0 %470  ;;  %v559_v45 = vpop.permute.xlu2 %558 }
 0x2e8   :  { %1198 = vmatpush.msk.msrb.mxu2 %vm468_vm10, %v494_v0  ;;  %1210 = vmatpush.msk.msrb.mxu3 %vm469_vm11, %v490_v2 }
 0x2ea   :  { %1199 = vmatpush.msk.msrb.mxu2 %vm468_vm10, %v493_v3  ;;  %1211 = vmatpush.msk.msrb.mxu3 %vm469_vm11, %v489_v4 }
 0x2ec   :  { %1200 = vmatpush.msk.msrb.mxu2 %vm468_vm10, %v492_v6  ;;  %1212 = vmatpush.msk.msrb.mxu3 %vm469_vm11, %v488_v8 }
 0x2ee   :  { %v479_v11 = vpop.permute.xlu1 %478 }
 0x2ef   :  { %v491_v13 = vsel %vm486_vm12, %v479_v11, %v471_v9  ;;  %v487_v14 = vsel %vm486_vm12, %v471_v9, %v479_v11  ;;  %v569_v27 = vpop.permute.xlu0 %568  ;;  %v672_v3 = vpop.permute.xlu2 %671 }
 0x2f0   :  { %1201 = vmatpush.msk.msrb.mxu2 %vm468_vm10, %v491_v13  ;;  %1213 = vmatpush.msk.msrb.mxu3 %vm469_vm11, %v487_v14 }
 0x2f1   :  { %1202 = vmatmul.msk.f32.vlgmr.msrb.gmra.mxu2 %vm268_vm6, %v1186_v12  ;;  %1214 = vmatmul.msk.f32.vlgmr.msrb.gmra.mxu3 %vm268_vm6, %v1186_v12 }
 0x2f6   :  { %v564_v39 = vpop.permute.xlu1 %563 }
 0x2f7   :  { %v682_v58 = vpop.permute.xlu0 %681 }
 0x2f9   :  { %1203 = vmatmul.msk.f32.gmra.mxu2 %vm268_vm6, %v1187_v16  ;;  %1215 = vmatmul.msk.f32.gmra.mxu3 %vm268_vm6, %v1187_v16 }
 0x2fe   :  { %v677_v13 = vpop.permute.xlu1 %676 }
 0x2ff   :  { %v667_v59 = vpop.permute.xlu0 %666 }
 0x301   :  { %1204 = vmatmul.msk.f32.gmra.mxu2 %vm268_vm6, %v1188_v19  ;;  %1216 = vmatmul.msk.f32.gmra.mxu3 %vm268_vm6, %v1188_v19 }
 0x309   :  { %1205 = vmatmul.msk.f32.gmra.mxu2 %vm268_vm6, %v1189_v20  ;;  %1217 = vmatmul.msk.f32.gmra.mxu3 %vm268_vm6, %v1189_v20 }
 0x374   :  { %v605_v21 = vpop.f32.mrf.mxu2  ;;  %v634_v22 = vpop.f32.mrf.mxu3 }
 0x375   :  { %v606_v46 = vadd.f32 %v605_v21, %v559_v45  ;;  %v635_v47 = vadd.f32 %v634_v22, %v559_v45 }
 0x377   :  { %v646_v52 = vmax.f32 %v606_v46, 0.0  ;;  %v647_v53 = vmax.f32 %v635_v47, 0.0 }
 0x37c   :  { %v608_v23 = vpop.f32.mrf.mxu2  ;;  %v637_v26 = vpop.f32.mrf.mxu3 }
 0x37d   :  { %v609_v40 = vadd.f32 %v608_v23, %v564_v39  ;;  %v638_v42 = vadd.f32 %v637_v26, %v564_v39  ;;  %v1270_v39 = vld [vmem:[%s2031_s6 + $0xa0] sm:$0xff] }
 0x37f   :  { %v648_v50 = vmax.f32 %v609_v40, 0.0  ;;  %v649_v51 = vmax.f32 %v638_v42, 0.0  ;;  %v1073_v40 = vld [vmem:[%s2033_s8] sm:$0xff]  ;;  %v1271_v42 = vld [vmem:[%s2031_s6 + $0xa8] sm:$0xff] }
 0x384   :  { %v611_v24 = vpop.f32.mrf.mxu2  ;;  %v640_v25 = vpop.f32.mrf.mxu3 }
 0x385   :  { %v612_v34 = vadd.f32 %v611_v24, %v569_v27  ;;  %v641_v35 = vadd.f32 %v640_v25, %v569_v27 }
 0x387   :  { %v650_v48 = vmax.f32 %v612_v34, 0.0  ;;  %v651_v49 = vmax.f32 %v641_v35, 0.0  ;;  %v1241_v34 = vld [vmem:[%s2031_s6 + $0x98] sm:$0xff] }
 0x388   :  { %v1273_v35 = vld [vmem:[%s2031_s6 + $0xb8] sm:$0xff] }
 0x38c   :  { %v614_v30 = vpop.f32.mrf.mxu2  ;;  %v643_v33 = vpop.f32.mrf.mxu3 }
 0x38d   :  { %v615_v36 = vadd.f32 %v614_v30, %v574_v28  ;;  %v644_v37 = vadd.f32 %v643_v33, %v574_v28  ;;  %v1239_v33 = vld [vmem:[%s2031_s6 + $0x88] sm:$0xff] }
 0x38f   :  { %v652_v43 = vmax.f32 %v615_v36, 0.0  ;;  %v653_v44 = vmax.f32 %v644_v37, 0.0  ;;  %v1272_v36 = vld [vmem:[%s2031_s6 + $0xb0] sm:$0xff]  ;;  %v1238_v37 = vld [vmem:[%s2031_s6 + $0x80] sm:$0xff] }
 0x391   :  { %708 = vmatpush.msra.mxu0 %v652_v43  ;;  %737 = vmatpush.msra.mxu1 %v653_v44 }
 0x393   :  { %709 = vmatpush.msra.mxu0 %v650_v48  ;;  %738 = vmatpush.msra.mxu1 %v651_v49 }
 0x395   :  { %710 = vmatpush.msra.mxu0 %v648_v50  ;;  %739 = vmatpush.msra.mxu1 %v649_v51 }
 0x397   :  { %711 = vmatpush.msra.mxu0 %v646_v52  ;;  %740 = vmatpush.msra.mxu1 %v647_v53 }
 0x398   :  { %1226 = vmatmul.msk.f32.vlgmr.msra.gmra.mxu0 %vm376_vm7, %v1218_v54  ;;  %1230 = vmatmul.msk.f32.vlgmr.msra.gmra.mxu1 %vm376_vm7, %v1218_v54 }
 0x3a0   :  { %1227 = vmatmul.msk.f32.gmra.mxu0 %vm376_vm7, %v1219_v55  ;;  %1231 = vmatmul.msk.f32.gmra.mxu1 %vm376_vm7, %v1219_v55 }
 0x3a8   :  { %1228 = vmatmul.msk.f32.gmra.mxu0 %vm376_vm7, %v1220_v56  ;;  %1232 = vmatmul.msk.f32.gmra.mxu1 %vm376_vm7, %v1220_v56 }
 0x3b0   :  { %1229 = vmatmul.msk.f32.gmra.mxu0 %vm376_vm7, %v1221_v57  ;;  %1233 = vmatmul.msk.f32.gmra.mxu1 %vm376_vm7, %v1221_v57 }
 0x415   :  { %v713_v60 = vpop.f32.mrf.mxu0  ;;  %v742_v61 = vpop.f32.mrf.mxu1 }
 0x416   :  { %v714_v62 = vadd.f32 %v713_v60, %v667_v59  ;;  %v743_v28 = vadd.f32 %v742_v61, %v667_v59 }
 0x418   :  { %v754_v0 = vadd.f32 %v714_v62, %v1602_v1 }
 0x41a   :  { %v1801_v2 = vmul.f32 %v754_v0, %v1598_v63 }
 0x41c   :  { %811 = vrot.lane.b32.xlu1 %v1801_v2, %s1326_s24 }
 0x41d   :  { %v716_v4 = vpop.f32.mrf.mxu0  ;;  %v745_v5 = vpop.f32.mrf.mxu1 }
 0x41e   :  { %v717_v6 = vadd.f32 %v716_v4, %v672_v3  ;;  %v746_v8 = vadd.f32 %v745_v5, %v672_v3 }
 0x420   :  { %v756_v9 = vadd.f32 %v717_v6, %v1611_v15  ;;  %v757_v11 = vadd.f32 %v746_v8, %v1614_v10 }
 0x422   :  { %v1808_v12 = vmul.f32 %v756_v9, %v1598_v63  ;;  %v1811_v1 = vmul.f32 %v757_v11, %v1606_v7 }
 0x424   :  { %821 = vrot.lane.b32.xlu0 %v1811_v1, %s1326_s24  ;;  %813 = vrot.lane.b32.xlu2 %v1808_v12, %s1326_s24 }
 0x425   :  { %v719_v14 = vpop.f32.mrf.mxu0  ;;  %v748_v16 = vpop.f32.mrf.mxu1 }
 0x426   :  { %v720_v19 = vadd.f32 %v719_v14, %v677_v13  ;;  %v749_v20 = vadd.f32 %v748_v16, %v677_v13  ;;  %v1234_v16 = vld [vmem:[%s2029_s4 + $0x40] sm:$0xff] }
 0x428   :  { %v758_v15 = vadd.f32 %v720_v19, %v1623_v17  ;;  %v759_v10 = vadd.f32 %v749_v20, %v1626_v18 }
 0x42a   :  { %v1820_v21 = vmul.f32 %v758_v15, %v1598_v63  ;;  %v1823_v22 = vmul.f32 %v759_v10, %v1606_v7  ;;  %v1235_v15 = vld [vmem:[%s2029_s4 + $0x48] sm:$0xff] }
 0x42c   :  { %823 = vrot.lane.b32.xlu1 %v1823_v22, %s1326_s24  ;;  %815 = vrot.lane.b32.xlu0 %v1820_v21, %s1326_s24 }
 0x42d   :  { %v722_v23 = vpop.f32.mrf.mxu0  ;;  %v751_v26 = vpop.f32.mrf.mxu1 }
 0x42e   :  { %v723_v24 = vadd.f32 %v722_v23, %v682_v58  ;;  %v752_v25 = vadd.f32 %v751_v26, %v682_v58 }
 0x430   :  { %v760_v17 = vadd.f32 %v723_v24, %v1635_v31  ;;  %v761_v18 = vadd.f32 %v752_v25, %v1638_v32  ;;  %v755_v31 = vadd.f32 %v743_v28, %v1647_v29  ;;  %v1240_v29 = vld [vmem:[%s2031_s6 + $0x90] sm:$0xff] }
 0x432   :  { %v1832_v27 = vmul.f32 %v760_v17, %v1598_v63  ;;  %v1835_v30 = vmul.f32 %v761_v18, %v1606_v7  ;;  %v1844_v32 = vmul.f32 %v755_v31, %v1606_v7 }
 0x434   :  { %825 = vrot.lane.b32.xlu2 %v1835_v30, %s1326_s24  ;;  %817 = vrot.lane.b32.xlu1 %v1832_v27, %s1326_s24 }
 0x435   :  { %784 = vrot.lane.b32.xlu0 %v1823_v22, %s1327_s25 }
 0x43c   :  { %819 = vrot.lane.b32.xlu2 %v1844_v32, %s1326_s24  ;;  %774 = vrot.lane.b32.xlu1 %v1808_v12, %s1327_s25 }
 0x43d   :  { %778 = vrot.lane.b32.xlu0 %v1832_v27, %s1327_s25 }
 0x444   :  { %786 = vrot.lane.b32.xlu1 %v1835_v30, %s1327_s25  ;;  %776 = vrot.lane.b32.xlu2 %v1820_v21, %s1327_s25 }
 0x445   :  { %772 = vrot.lane.b32.xlu0 %v1801_v2, %s1327_s25 }
 0x44c   :  { %780 = vrot.lane.b32.xlu1 %v1844_v32, %s1327_s25  ;;  %782 = vrot.lane.b32.xlu2 %v1811_v1, %s1327_s25 }
 0x44d   :  { %870 = vperm.xlu0 %1292, %v1240_v29  }
 0x454   :  { %865 = vperm.xlu1 %1293, %v1239_v33   ;;  %875 = vperm.xlu2 %1294, %v1241_v34  }
 0x455   :  { %983 = vperm.xlu0 %1292, %v1273_v35  }
 0x45c   :  { %978 = vperm.xlu1 %1293, %v1272_v36   ;;  %860 = vperm.xlu2 %1294, %v1238_v37  }
 0x45d   :  { %968 = vperm.xlu0 %1292, %v1270_v39  }
 0x464   :  { %1076 = vperm.xlu1 %1293, %v1073_v40   ;;  %973 = vperm.xlu2 %1294, %v1271_v42  }
 0x47e   :  { %v814_v43 = vpop.permute.xlu2 %813 }
 0x48e   :  { %v812_v44 = vpop.permute.xlu1 %811  ;;  %v826_v46 = vpop.permute.xlu2 %825 }
 0x496   :  { %v822_v45 = vpop.permute.xlu0 %821  ;;  %v820_v49 = vpop.permute.xlu2 %819 }
 0x497   :  { %v829_v56 = vsel %vm809_vm14, %v814_v43, %v822_v45  ;;  %v833_v57 = vsel %vm809_vm14, %v822_v45, %v814_v43  ;;  %v828_v58 = vsel %vm809_vm14, %v812_v44, %v820_v49  ;;  %v832_v59 = vsel %vm809_vm14, %v820_v49, %v812_v44 }
 0x49e   :  { %v824_v47 = vpop.permute.xlu1 %823  ;;  %v816_v48 = vpop.permute.xlu0 %815 }
 0x49f   :  { %v830_v53 = vsel %vm809_vm14, %v816_v48, %v824_v47  ;;  %v834_v54 = vsel %vm809_vm14, %v824_v47, %v816_v48  ;;  %v777_v61 = vpop.permute.xlu2 %776 }
 0x4a6   :  { %v818_v50 = vpop.permute.xlu1 %817 }
 0x4a7   :  { %v831_v51 = vsel %vm809_vm14, %v818_v50, %v826_v46  ;;  %v835_v52 = vsel %vm809_vm14, %v826_v46, %v818_v50  ;;  %v785_v55 = vpop.permute.xlu0 %784  ;;  %v783_v8 = vpop.permute.xlu2 %782 }
 0x4a8   :  { %1242 = vmatpush.msk.msra.mxu2 %vm809_vm14, %v831_v51  ;;  %1254 = vmatpush.msk.msra.mxu3 %vm810_vm13, %v835_v52  ;;  %v791_v5 = vsel %vm788_vm1, %v777_v61, %v785_v55  ;;  %v795_v6 = vsel %vm788_vm1, %v785_v55, %v777_v61  ;;  %v1268_v55 = vld [vmem:[%s2030_s5 + $0x50] sm:$0xff] }
 0x4aa   :  { %1243 = vmatpush.msk.msra.mxu2 %vm809_vm14, %v830_v53  ;;  %1255 = vmatpush.msk.msra.mxu3 %vm810_vm13, %v834_v54  ;;  %v1266_v53 = vld [vmem:[%s2030_s5 + $0x40] sm:$0xff]  ;;  %v1267_v54 = vld [vmem:[%s2030_s5 + $0x48] sm:$0xff] }
 0x4ac   :  { %1244 = vmatpush.msk.msra.mxu2 %vm809_vm14, %v829_v56  ;;  %1256 = vmatpush.msk.msra.mxu3 %vm810_vm13, %v833_v57  ;;  %v1269_v56 = vld [vmem:[%s2030_s5 + $0x58] sm:$0xff] }
 0x4ae   :  { %1245 = vmatpush.msk.msra.mxu2 %vm809_vm14, %v828_v58  ;;  %1257 = vmatpush.msk.msra.mxu3 %vm810_vm13, %v832_v59  ;;  %v775_v60 = vpop.permute.xlu1 %774 }
 0x4af   :  { %v779_v62 = vpop.permute.xlu0 %778  ;;  %v790_v9 = vsel %vm788_vm1, %v775_v60, %v783_v8  ;;  %v794_v11 = vsel %vm788_vm1, %v783_v8, %v775_v60  ;;  %v876_v18 = vpop.permute.xlu2 %875 }
 0x4b0   :  { %898 = vmatpush.msra.mxu2 %v1832_v27  ;;  %927 = vmatpush.msra.mxu3 %v1835_v30 }
 0x4b2   :  { %899 = vmatpush.msra.mxu2 %v1820_v21  ;;  %928 = vmatpush.msra.mxu3 %v1823_v22 }
 0x4b4   :  { %900 = vmatpush.msra.mxu2 %v1808_v12  ;;  %929 = vmatpush.msra.mxu3 %v1811_v1 }
 0x4b6   :  { %901 = vmatpush.msra.mxu2 %v1801_v2  ;;  %930 = vmatpush.msra.mxu3 %v1844_v32  ;;  %v787_v0 = vpop.permute.xlu1 %786 }
 0x4b7   :  { %v792_v3 = vsel %vm788_vm1, %v779_v62, %v787_v0  ;;  %v796_v4 = vsel %vm788_vm1, %v787_v0, %v779_v62  ;;  %v773_v13 = vpop.permute.xlu0 %772  ;;  %v861_v44 = vpop.permute.xlu2 %860 }
 0x4b8   :  { %1246 = vmatpush.msk.msra.mxu2 %vm770_vm15, %v796_v4  ;;  %1258 = vmatpush.msk.msra.mxu3 %vm771_vm0, %v792_v3 }
 0x4ba   :  { %1247 = vmatpush.msk.msra.mxu2 %vm770_vm15, %v795_v6  ;;  %1259 = vmatpush.msk.msra.mxu3 %vm771_vm0, %v791_v5 }
 0x4bc   :  { %1248 = vmatpush.msk.msra.mxu2 %vm770_vm15, %v794_v11  ;;  %1260 = vmatpush.msk.msra.mxu3 %vm771_vm0, %v790_v9 }
 0x4be   :  { %v781_v14 = vpop.permute.xlu1 %780 }
 0x4bf   :  { %v789_v19 = vsel %vm788_vm1, %v773_v13, %v781_v14  ;;  %v793_v20 = vsel %vm788_vm1, %v781_v14, %v773_v13  ;;  %v871_v28 = vpop.permute.xlu0 %870  ;;  %v974_v4 = vpop.permute.xlu2 %973 }
 0x4c0   :  { %1249 = vmatpush.msk.msra.mxu2 %vm770_vm15, %v793_v20  ;;  %1261 = vmatpush.msk.msra.mxu3 %vm771_vm0, %v789_v19 }
 0x4c1   :  { %1250 = vmatmul.msk.f32.vlgmr.msra.gmra.mxu2 %vm268_vm6, %v1234_v16  ;;  %1262 = vmatmul.msk.f32.vlgmr.msra.gmra.mxu3 %vm268_vm6, %v1234_v16 }
 0x4c6   :  { %v866_v37 = vpop.permute.xlu1 %865 }
 0x4c7   :  { %v984_v61 = vpop.permute.xlu0 %983 }
 0x4c9   :  { %1251 = vmatmul.msk.f32.gmra.mxu2 %vm268_vm6, %v1235_v15  ;;  %1263 = vmatmul.msk.f32.gmra.mxu3 %vm268_vm6, %v1235_v15 }
 0x4ce   :  { %v979_v3 = vpop.permute.xlu1 %978 }
 0x4cf   :  { %v969_v11 = vpop.permute.xlu0 %968 }
 0x4d1   :  { %1252 = vmatmul.msk.f32.gmra.mxu2 %vm268_vm6, %v1236_v38  ;;  %1264 = vmatmul.msk.f32.gmra.mxu3 %vm268_vm6, %v1236_v38 }
 0x4d9   :  { %1253 = vmatmul.msk.f32.gmra.mxu2 %vm268_vm6, %v1237_v41  ;;  %1265 = vmatmul.msk.f32.gmra.mxu3 %vm268_vm6, %v1237_v41 }
 0x544   :  { %v907_v10 = vpop.f32.mrf.mxu2  ;;  %v936_v23 = vpop.f32.mrf.mxu3 }
 0x545   :  { %v908_v45 = vadd.f32 %v907_v10, %v861_v44  ;;  %v937_v46 = vadd.f32 %v936_v23, %v861_v44 }
 0x547   :  { %v948_v51 = vmax.f32 %v908_v45, 0.0  ;;  %v949_v52 = vmax.f32 %v937_v46, 0.0 }
 0x54c   :  { %v910_v26 = vpop.f32.mrf.mxu2  ;;  %v939_v24 = vpop.f32.mrf.mxu3 }
 0x54d   :  { %v911_v39 = vadd.f32 %v910_v26, %v866_v37  ;;  %v940_v40 = vadd.f32 %v939_v24, %v866_v37 }
 0x54f   :  { %v950_v49 = vmax.f32 %v911_v39, 0.0  ;;  %v951_v50 = vmax.f32 %v940_v40, 0.0 }
 0x554   :  { %v913_v25 = vpop.f32.mrf.mxu2  ;;  %v942_v17 = vpop.f32.mrf.mxu3 }
 0x555   :  { %v914_v33 = vadd.f32 %v913_v25, %v871_v28  ;;  %v943_v34 = vadd.f32 %v942_v17, %v871_v28 }
 0x557   :  { %v952_v47 = vmax.f32 %v914_v33, 0.0  ;;  %v953_v48 = vmax.f32 %v943_v34, 0.0 }
 0x55c   :  { %v916_v31 = vpop.f32.mrf.mxu2  ;;  %v945_v29 = vpop.f32.mrf.mxu3 }
 0x55d   :  { %v917_v35 = vadd.f32 %v916_v31, %v876_v18  ;;  %v946_v36 = vadd.f32 %v945_v29, %v876_v18 }
 0x55f   :  { %v954_v42 = vmax.f32 %v917_v35, 0.0  ;;  %v955_v43 = vmax.f32 %v946_v36, 0.0 }
 0x561   :  { %1010 = vmatpush.msrb.mxu0 %v954_v42  ;;  %1039 = vmatpush.msrb.mxu1 %v955_v43 }
 0x563   :  { %1011 = vmatpush.msrb.mxu0 %v952_v47  ;;  %1040 = vmatpush.msrb.mxu1 %v953_v48 }
 0x565   :  { %1012 = vmatpush.msrb.mxu0 %v950_v49  ;;  %1041 = vmatpush.msrb.mxu1 %v951_v50 }
 0x567   :  { %1013 = vmatpush.msrb.mxu0 %v948_v51  ;;  %1042 = vmatpush.msrb.mxu1 %v949_v52 }
 0x568   :  { %1274 = vmatmul.msk.f32.vlgmr.msrb.gmra.mxu0 %vm376_vm7, %v1266_v53  ;;  %1278 = vmatmul.msk.f32.vlgmr.msrb.gmra.mxu1 %vm376_vm7, %v1266_v53 }
 0x570   :  { %1275 = vmatmul.msk.f32.gmra.mxu0 %vm376_vm7, %v1267_v54  ;;  %1279 = vmatmul.msk.f32.gmra.mxu1 %vm376_vm7, %v1267_v54 }
 0x578   :  { %1276 = vmatmul.msk.f32.gmra.mxu0 %vm376_vm7, %v1268_v55  ;;  %1280 = vmatmul.msk.f32.gmra.mxu1 %vm376_vm7, %v1268_v55 }
 0x580   :  { %1277 = vmatmul.msk.f32.gmra.mxu0 %vm376_vm7, %v1269_v56  ;;  %1281 = vmatmul.msk.f32.gmra.mxu1 %vm376_vm7, %v1269_v56 }
 0x5e5   :  { %v1015_v57 = vpop.f32.mrf.mxu0  ;;  %v1044_v58 = vpop.f32.mrf.mxu1 }
 0x5e6   :  { %v1016_v20 = vadd.f32 %v1015_v57, %v969_v11  ;;  %v1045_v15 = vadd.f32 %v1044_v58, %v969_v11 }
 0x5e8   :  { %v1056_v18 = vadd.f32 %v1016_v20, %v1801_v2  ;;  %v1057_v28 = vadd.f32 %v1045_v15, %v1844_v32  ;;  %v1077_v32 = vpop.permute.xlu1 %1076 }
 0x5ea   :  { %v1065_v2 = vmul.f32 %v1057_v28, %v1606_v7 }
 0x5ed   :  { %v1018_v59 = vpop.f32.mrf.mxu0  ;;  %v1047_v60 = vpop.f32.mrf.mxu1 }
 0x5ee   :  { %v1019_v13 = vadd.f32 %v1018_v59, %v974_v4  ;;  %v1048_v14 = vadd.f32 %v1047_v60, %v974_v4 }
 0x5f0   :  { %v1058_v26 = vadd.f32 %v1019_v13, %v1808_v12  ;;  %v1059_v24 = vadd.f32 %v1048_v14, %v1811_v1 }
 0x5f2   :  { %v1066_v12 = vmul.f32 %v1058_v26, %v1598_v63  ;;  %v1067_v1 = vmul.f32 %v1059_v24, %v1606_v7 }
 0x5f5   :  { %v1021_v62 = vpop.f32.mrf.mxu0  ;;  %v1050_v0 = vpop.f32.mrf.mxu1 }
 0x5f6   :  { %v1022_v5 = vadd.f32 %v1021_v62, %v979_v3  ;;  %v1051_v6 = vadd.f32 %v1050_v0, %v979_v3 }
 0x5f8   :  { %v1060_v38 = vadd.f32 %v1022_v5, %v1820_v21  ;;  %v1061_v41 = vadd.f32 %v1051_v6, %v1823_v22 }
 0x5fa   :  { %v1068_v21 = vmul.f32 %v1060_v38, %v1598_v63  ;;  %v1069_v22 = vmul.f32 %v1061_v41, %v1606_v7 }
 0x5fd   :  { %v1024_v8 = vpop.f32.mrf.mxu0  ;;  %v1053_v9 = vpop.f32.mrf.mxu1 }
 0x5fe   :  { %v1025_v16 = vadd.f32 %v1024_v8, %v984_v61  ;;  %v1054_v19 = vadd.f32 %v1053_v9, %v984_v61 }
 0x600   :  { %v1062_v10 = vadd.f32 %v1025_v16, %v1832_v27  ;;  %v1063_v23 = vadd.f32 %v1054_v19, %v1835_v30  ;;  %v1064_v27 = vmul.f32 %v1056_v18, %v1598_v63  ;;  %v1072_v30 = vld [vmem:[%s2032_s7] sm:$0xff] }
 0x602   :  { %v1070_v25 = vmul.f32 %v1062_v10, %v1598_v63  ;;  %v1071_v17 = vmul.f32 %v1063_v23, %v1606_v7 }
 0x604   :  { %1094 = vmatpush.msrb.mxu2 %v1070_v25  ;;  %1114 = vmatpush.msrb.mxu3 %v1071_v17 }
 0x606   :  { %1095 = vmatpush.msrb.mxu2 %v1068_v21  ;;  %1115 = vmatpush.msrb.mxu3 %v1069_v22 }
 0x608   :  { %1096 = vmatpush.msrb.mxu2 %v1066_v12  ;;  %1116 = vmatpush.msrb.mxu3 %v1067_v1 }
 0x60a   :  { %1097 = vmatpush.msrb.mxu2 %v1064_v27  ;;  %1117 = vmatpush.msrb.mxu3 %v1065_v2 }
 0x60b   :  { %1282 = vmatmul.msk.f32.vlgmr.msrb.gmra.mxu2 %vm376_vm7, %v1072_v30  ;;  %1283 = vmatmul.msk.f32.vlgmr.msrb.gmra.mxu3 %vm376_vm7, %v1072_v30 }
 0x68e   :  { %v1099_v31 = vpop.f32.mrf.mxu2  ;;  %v1119_v29 = vpop.f32.mrf.mxu3 }
 0x68f   :  { %v1100_v33 = vadd.f32 %v1099_v31, %v1077_v32  ;;  %v1120_v34 = vadd.f32 %v1119_v29, %v1077_v32 }
 0x691   :  { %v1122_v35 = vmul.f32 %v1100_v33, %v1598_v63  ;;  %v1123_v36 = vmul.f32 %v1120_v34, %v1606_v7 }
 0x693   :  { %1124 = vst [vmem:[#allocation2] sm:$0xff] %v1122_v35 }
 0x694   :  { %1125 = vst [vmem:[#allocation2 + $0x8] sm:$0xff] %v1123_v36 }
 0x695   :  { %1136 = dma.vmem_to_hbm [thread:$0]  %s1132_s11, 256, %s1134_s14, [#allocation3]  }
 0x696   :  { %1319 = dma.done.wait [#allocation3], 256  }
 0x697   :  { %1320 = vsyncadd [#allocation3], 4294967040 }
 0x698   :  { %1141 = vsyncpa [#allocation3], 1 }

</bundles_post_ra>
